<compile_context>
chip_gen: v6e
topology: v6e:2x2x1
jax: 0.10.0
libtpu: 0.0.40
codegen_flags: <defaults>
</compile_context>

<pallas_src>
import jax
import jax.numpy as jnp
from jax import lax
from jax.experimental import pallas as pl
from jax.experimental.pallas import tpu as pltpu


def _sublane_rows(dtype):
    """Native sublane tile for the dtype: 8 rows (4-byte), 16 (2-byte), 32 (1-byte)."""
    return {4: 8, 2: 16, 1: 32}.get(jnp.dtype(dtype).itemsize, 8)


def _choose_lane_width(F, sublane, lane_cap):
    """Largest multiple of 128 that divides F, <= lane_cap, leaving >= sublane rows/sample."""
    best = None
    c = 128
    cap = min(F, lane_cap)
    while c <= cap:
        if F % c == 0 and (F // c) >= sublane:
            best = c
        c += 128
    return best


def _choose_row_tile(R, Cw, itemsize, sublane, target_bytes):
    """Rows per block: ~target_bytes, sublane-aligned, preferring exact divisors of R
    (no ragged tail block -> unmasked stores and a balanced v7x 2-TC split)."""
    row_bytes = Cw * itemsize
    if R * row_bytes <= target_bytes:
        return R  # whole sample in one exact (full-dim) block
    ideal = max(sublane, (min(R, target_bytes // row_bytes) // sublane) * sublane)
    tr = ideal
    while tr >= max(sublane, ideal // 2):
        if R % tr == 0:
            return tr
        tr -= sublane
    return ideal  # ragged tail handled by Pallas


def _build_kernel(inv_keep, with_residual):
    # Compute in f32 and cast once so 1/keep_prob is not rounded to the storage
    # dtype (matches timm/PyTorch numerics for bf16/fp16 inputs).
    if with_residual:
        def kernel(keep_ref, fs_ref, ft_ref, x_ref, r_ref, o_ref):
            b = pl.program_id(0)

            @pl.when(keep_ref[b] == 1)
            def _():
                o_ref[...] = (r_ref[...].astype(jnp.float32)
                              + x_ref[...].astype(jnp.float32) * inv_keep
                              ).astype(o_ref.dtype)

            @pl.when(keep_ref[b] == 0)
            def _():
                # Dropped sample: x was not fetched (stale buffer) and is not read.
                o_ref[...] = r_ref[...]
    else:
        def kernel(keep_ref, fs_ref, ft_ref, x_ref, o_ref):
            b = pl.program_id(0)

            @pl.when(keep_ref[b] == 1)
            def _():
                o_ref[...] = (x_ref[...].astype(jnp.float32) * inv_keep
                              ).astype(o_ref.dtype)

            @pl.when(keep_ref[b] == 0)
            def _():
                o_ref[...] = jnp.zeros_like(o_ref)
    return kernel


def drop_path_pallas(x, drop_prob, training, key, *, residual=None,
                     target_block_bytes=6 * 1024 * 1024,
                     lane_cap=1024,
                     vmem_limit_bytes=48 * 1024 * 1024):
    """x: (B, ...). Returns same shape/dtype. drop_prob/training must be static.
    If `residual` (same shape/dtype as x) is given, returns residual + drop_path(x)
    fused in one HBM pass."""
    if residual is not None:
        assert residual.shape == x.shape and residual.dtype == x.dtype

    if drop_prob is None or drop_prob == 0.0 or not training:
        return x if residual is None else x + residual

    keep_prob = 1.0 - float(drop_prob)
    inv_keep = 1.0 / keep_prob
    orig_shape = x.shape
    B = orig_shape[0]
    F = 1
    for d in orig_shape[1:]:
        F *= int(d)

    # Per-sample keep decision (tiny, B values) — plain JAX glue, like torch.rand.
    u = jax.random.uniform(key, (B,), dtype=jnp.float32)
    keep_f = jnp.floor(keep_prob + u)            # {0., 1.}
    keep_i32 = keep_f.astype(jnp.int32)

    itemsize = jnp.dtype(x.dtype).itemsize
    sub = _sublane_rows(x.dtype)
    Cw = _choose_lane_width(F, sub, lane_cap)

    use_fallback = Cw is None
    # Huge batch of tiny samples: per-step pipeline overhead would dominate a
    # per-sample grid; a fused XLA multiply is the right tool there.
    if not use_fallback and B > 256 and F * itemsize < (128 << 10):
        use_fallback = True

    if use_fallback:
        scale = (keep_f * inv_keep).reshape((B,) + (1,) * (x.ndim - 1))
        out = (x.astype(jnp.float32) * scale).astype(x.dtype)
        return out if residual is None else out + residual

    R = F // Cw
    TR = _choose_row_tile(R, Cw, itemsize, sub, target_block_bytes)
    T = -(-R // TR)                              # row-tiles per sample

    x3 = x.reshape(B, R, Cw)                     # contiguous: no data movement
    res3 = residual.reshape(B, R, Cw) if residual is not None else None

    # Scalar-prefetch tables.  For dropped samples the x index_map re-points at
    # the most recent kept sample's LAST tile, i.e. the block already resident
    # from the previous grid step, so the pipeline skips the (unused) fetch.
    idx = jnp.arange(B, dtype=jnp.int32)
    last_kept = lax.cummax(jnp.where(keep_i32 == 1, idx, -1), axis=0)
    fetch_s = jnp.maximum(last_kept, 0).astype(jnp.int32)
    fetch_t = jnp.where((keep_i32 == 0) & (last_kept >= 0), T - 1, 0).astype(jnp.int32)

    kernel = _build_kernel(inv_keep, res3 is not None)

    def x_map(b, t, keep, fs, ft):
        k = keep[b]
        return (fs[b], k * t + (1 - k) * ft[b], 0)

    def io_map(b, t, keep, fs, ft):
        return (b, t, 0)

    in_specs = [pl.BlockSpec((1, TR, Cw), x_map)]
    operands = [keep_i32, fetch_s, fetch_t, x3]
    if res3 is not None:
        in_specs.append(pl.BlockSpec((1, TR, Cw), io_map))
        operands.append(res3)

    out = pl.pallas_call(
        kernel,
        out_shape=jax.ShapeDtypeStruct((B, R, Cw), x.dtype),
        grid_spec=pltpu.PrefetchScalarGridSpec(
            num_scalar_prefetch=3,
            grid=(B, T),
            in_specs=in_specs,
            out_specs=pl.BlockSpec((1, TR, Cw), io_map),
        ),
        compiler_params=pltpu.CompilerParams(
            dimension_semantics=("parallel", "arbitrary"),
            # Worst-case double-buffered footprint: 2 x (x + out [+ residual])
            # x ~6 MiB = 24-36 MiB; 48 MiB fits v7x's 64 MiB physical VMEM and
            # leaves headroom on v5e/v6e (128 MiB physical).
            vmem_limit_bytes=vmem_limit_bytes,
        ),
    )(*operands)

    return out.reshape(orig_shape)


class DropPath:
    """JAX/Pallas port of the PyTorch DropPath module."""

    def __init__(self, drop_prob=None):
        self.drop_prob = drop_prob
        self.training = True

    def __call__(self, x, key, residual=None):
        return drop_path_pallas(x, self.drop_prob, self.training, key,
                                residual=residual)


if __name__ == "__main__":
    root = jax.random.PRNGKey(0)
    kx, kr, kd, kd2 = jax.random.split(root, 4)

    def reference(xv, p, k, residual=None):
        kp = 1.0 - p
        b = xv.shape[0]
        uu = jax.random.uniform(k, (b,), dtype=jnp.float32)
        m = jnp.floor(kp + uu) / kp
        out = xv * m.reshape((b,) + (1,) * (xv.ndim - 1))
        return out if residual is None else out + residual

    # 1) Spec shape from the module's typical use: (B, C, H, W) = (2, 4, 16, 16).
    B, C, H, W = 2, 4, 16, 16
    x = jax.random.normal(kx, (B, C, H, W), dtype=jnp.float32)
    module = DropPath(drop_prob=0.3)
    module.training = True
    y = jax.block_until_ready(module(x, kd))
    y_ref = reference(x, 0.3, kd)
    assert y.shape == x.shape and y.dtype == x.dtype
    assert jnp.allclose(y, y_ref, atol=1e-5), "drop_path mismatch vs reference"

    # 2) Fused residual add (removes a full HBM pass in residual blocks).
    res = jax.random.normal(kr, (B, C, H, W), dtype=jnp.float32)
    y_fused = jax.block_until_ready(drop_path_pallas(x, 0.3, True, kd, residual=res))
    assert jnp.allclose(y_fused, y_ref + res, atol=1e-5), "fused residual mismatch"

    # 3) Multi-sample / multi-tile grid (exercises dropped-sample read skipping
    #    and per-sample row-tiling) at a small shape via a small block target.
    x_med = jax.random.normal(kx, (4, 8, 32, 128), dtype=jnp.float32)
    y_med = jax.block_until_ready(
        drop_path_pallas(x_med, 0.5, True, kd2, target_block_bytes=64 * 1024))
    assert jnp.allclose(y_med, reference(x_med, 0.5, kd2), atol=1e-5), "multi-tile mismatch"

    # 4) Eval mode: identity.
    module.training = False
    y_eval = jax.block_until_ready(module(x, kd))
    assert jnp.array_equal(y_eval, x), "eval mode should be identity"

    # 5) Fallback path (feature dim not a multiple of 128) still matches reference.
    module.training = True
    x_odd = jax.random.normal(kx, (B, 3, 5, 7), dtype=jnp.float32)
    y_odd = jax.block_until_ready(module(x_odd, kd))
    assert jnp.allclose(y_odd, reference(x_odd, 0.3, kd), atol=1e-5), "fallback mismatch"

    print("KERNEL_OK")
</pallas_src>

<mosaic_0001>
module attributes {stable_mosaic.version = 11 : i64} {
  func.func @kernel(%arg0: i32, %arg1: i32, %arg2: memref<2xi32, #tpu.memory_space<smem>>, %arg3: memref<2xi32, #tpu.memory_space<smem>>, %arg4: memref<2xi32, #tpu.memory_space<smem>>, %arg5: memref<1x8x128xf32, #tpu.memory_space<vmem>>, %arg6: memref<1x8x128xf32, #tpu.memory_space<vmem>>) attributes {dimension_semantics = [#tpu.dimension_semantics<parallel>, #tpu.dimension_semantics<arbitrary>], iteration_bounds = array<i64: 2, 1>, scalar_prefetch = 3 : i64, scratch_operands = 0 : i64, tpu.core_type = #tpu.core_type<tc>, window_params = [{transform_indices = @transform_0, window_bounds = array<i64: 1, 8, 128>}, {transform_indices = @transform_1, window_bounds = array<i64: 1, 8, 128>}]} {
    %0 = arith.index_cast %arg0 : i32 to index
    %1 = memref.load %arg2[%0] : memref<2xi32, #tpu.memory_space<smem>>
    %c1_i32 = arith.constant 1 : i32
    %2 = arith.cmpi eq, %1, %c1_i32 : i32
    %3 = arith.extui %2 : i1 to i32
    %c0_i32 = arith.constant 0 : i32
    %4 = arith.cmpi ne, %3, %c0_i32 : i32
    scf.if %4 {
      %c0 = arith.constant 0 : index
      %c0_2 = arith.constant 0 : index
      %c0_3 = arith.constant 0 : index
      %10 = vector.load %arg5[%c0, %c0_2, %c0_3] : memref<1x8x128xf32, #tpu.memory_space<vmem>>, vector<1x8x128xf32>
      %cst = arith.constant 1.42857146 : f32
      %11 = vector.broadcast %cst : f32 to vector<1x8x128xf32>
      %12 = arith.mulf %10, %11 : vector<1x8x128xf32>
      %c0_4 = arith.constant 0 : index
      %c0_5 = arith.constant 0 : index
      %c0_6 = arith.constant 0 : index
      %13 = vector.load %arg6[%c0_4, %c0_5, %c0_6] : memref<1x8x128xf32, #tpu.memory_space<vmem>>, vector<1x8x128xf32>
      tpu.vector_store %arg6[%c0_4, %c0_5, %c0_6], %12 {strides = array<i32>} : memref<1x8x128xf32, #tpu.memory_space<vmem>>, vector<1x8x128xf32>,
    } else {
    }
    %5 = arith.index_cast %arg0 : i32 to index
    %6 = memref.load %arg2[%5] : memref<2xi32, #tpu.memory_space<smem>>
    %c0_i32_0 = arith.constant 0 : i32
    %7 = arith.cmpi eq, %6, %c0_i32_0 : i32
    %8 = arith.extui %7 : i1 to i32
    %c0_i32_1 = arith.constant 0 : i32
    %9 = arith.cmpi ne, %8, %c0_i32_1 : i32
    scf.if %9 {
      %cst = arith.constant 0.000000e+00 : f32
      %10 = vector.broadcast %cst : f32 to vector<1x8x128xf32>
      %c0 = arith.constant 0 : index
      %c0_2 = arith.constant 0 : index
      %c0_3 = arith.constant 0 : index
      %11 = vector.load %arg6[%c0, %c0_2, %c0_3] : memref<1x8x128xf32, #tpu.memory_space<vmem>>, vector<1x8x128xf32>
      tpu.vector_store %arg6[%c0, %c0_2, %c0_3], %10 {strides = array<i32>} : memref<1x8x128xf32, #tpu.memory_space<vmem>>, vector<1x8x128xf32>,
    } else {
    }
    return
  }
  func.func @transform_0(%arg0: i32, %arg1: i32, %arg2: memref<2xi32, #tpu.memory_space<smem>>, %arg3: memref<2xi32, #tpu.memory_space<smem>>, %arg4: memref<2xi32, #tpu.memory_space<smem>>) -> (i32, i32, i32) {
    %0 = arith.index_cast %arg0 : i32 to index
    %1 = memref.load %arg2[%0] : memref<2xi32, #tpu.memory_space<smem>>
    %2 = arith.index_cast %arg0 : i32 to index
    %3 = memref.load %arg3[%2] : memref<2xi32, #tpu.memory_space<smem>>
    %4 = arith.muli %1, %arg1 : i32
    %c1_i32 = arith.constant 1 : i32
    %5 = arith.subi %c1_i32, %1 : i32
    %6 = arith.index_cast %arg0 : i32 to index
    %7 = memref.load %arg4[%6] : memref<2xi32, #tpu.memory_space<smem>>
    %8 = arith.muli %5, %7 : i32
    %9 = arith.addi %4, %8 : i32
    %c0_i32 = arith.constant 0 : i32
    %c0_i32_0 = arith.constant 0 : i32
    return %3, %9, %c0_i32 : i32, i32, i32
  }
  func.func @transform_1(%arg0: i32, %arg1: i32, %arg2: memref<2xi32, #tpu.memory_space<smem>>, %arg3: memref<2xi32, #tpu.memory_space<smem>>, %arg4: memref<2xi32, #tpu.memory_space<smem>>) -> (i32, i32, i32) {
    %c0_i32 = arith.constant 0 : i32
    %c0_i32_0 = arith.constant 0 : i32
    return %arg0, %arg1, %c0_i32 : i32, i32, i32
  }
}

</mosaic_0001>

<bundles_post_ra>
// kernel: tpu_custom_call.1
= control target key start
LH: loop header
LB: loop body
LE: loop exit
PB: predicated region body
PF: predicated region fallthrough
CT: control target
= control target key end

     0   :  { %s587_s15 = smov [#allocation3]   ;;  %s830_s0 = inlined_call_operand.hbm [shape: s32[2], index: 0, kind: input, shape index: {}]   ;;  %s831_s3 = inlined_call_operand.hbm [shape: f32[2,8,128], index: 3, kind: input, shape index: {}]   ;;  %s832_s4 = inlined_call_operand.hbm [shape: f32[2,8,128], index: 4, kind: output, shape index: {}]   ;;  %s833_s1 = inlined_call_operand.vmem [shape: s32[2], index: 1, kind: input, shape index: {}]   ;;  %s834_s2 = inlined_call_operand.vmem [shape: s32[2], index: 2, kind: input, shape index: {}]  }
   0x1   :  { %10 = dma.hbm_to_smem %s830_s0, 16, %s587_s15, [#allocation2] }
   0x2   :  { %s11_s20 = sshll.u32 %s833_s1, 4  ;;  %s15_s23 = sshll.u32 %s834_s2, 4  ;;  %s12_s20 = int_to_ptr.vmem [resolvable:$true] %s11_s20  ;;  %s16_s23 = int_to_ptr.vmem [resolvable:$true] %s15_s23 }
   0x3   :  { %s427_s24 = scalar_lea.vmem %s12_s20, 16  ;;  %p432_p1 = scmp.lt.s32.totalorder %s12_s20, %s12_s20 }
   0x4   :  { %p428_p0 = scmp.ne.s32.totalorder %s12_s20, %s427_s24  ;;  %p433_p2 = scmp.lt.s32.totalorder %s427_s24, %s427_s24 }
   0x6   :  { %p434_p3 = por %p433_p2, %p432_p1 }
   0x8   :  { %p435_p4 = pnand %p434_p3, %p428_p0 }
   0xa   :  { %438 = shalt.err (!%p435_p4)  }
   0xb   :  { %s588_s25 = smov [#allocation4]   ;;  %s439_s0 = scalar_lea.vmem %s16_s23, 16 }
   0xc   :  { %14 = dma.vmem_to_smem %s12_s20, 16, %s588_s25, [#allocation2] }
   0xd   :  { %p440_p5 = scmp.ne.s32.totalorder %s16_s23, %s439_s0  ;;  %p444_p6 = scmp.lt.s32.totalorder %s16_s23, %s16_s23 }
   0xe   :  { %p445_p7 = scmp.lt.s32.totalorder %s439_s0, %s439_s0 }
  0x10   :  { %p446_p8 = por %p445_p7, %p444_p6 }
  0x12   :  { %p447_p9 = pnand %p446_p8, %p440_p5 }
  0x14   :  { %450 = shalt.err (!%p447_p9)  }
  0x15   :  { %s589_s1 = smov [#allocation5]  }
  0x16   :  { %18 = dma.vmem_to_smem %s16_s23, 16, %s589_s1, [#allocation2] }
  0x17   :  { %541 = dma.done.wait [#allocation2], 48 }
  0x18   :  { %542 = vsyncadd [#allocation2], 4294967248 }
  0x19   :  { %20 = sfence }
  0x1a   :  { %21 = vsyncpa [#allocation7], 0 }
  0x1b   :  { %23 = vsyncpa [#allocation7 + $0x1], 0 }
  0x1c   :  { %24 = vsyncpa [#allocation8], 0 }
  0x1d   :  { %26 = vsyncpa [#allocation8 + $0x1], 0  ;;  %s627_s2 = smov 0   ;;  %s629_s26 = smov 0  }
  0x1e   :  { %s631_s27 = smov 0   ;;  %s633_s28 = smov 0  }
  0x1f   :  { %s635_s29 = smov 0   ;;  %s637_s30 = smov 0  }
  0x20   :  { %s639_s5 = smov 0   ;;  %s641_s6 = smov 0  }
  0x21   :  { %s643_s7 = smov 0  }
  0x22 LB: > { %840 = sst [smem:[#allocation19_spill]] %s573_s30  ;;  %s302_s8 = sadd.s32 4294967295, %s585_s7   ;;  %s585_s7 = sphi %s643_s7, %s32_s7   ;;  %s581_s6 = sphi %s641_s6, %s860_s6   ;;  %s577_s5 = sphi %s639_s5, %s859_s5   ;;  %s573_s30 = sphi %s637_s30, %s858_s30   ;;  %s569_s29 = sphi %s635_s29, %s865_s29   ;;  %s565_s28 = sphi %s633_s28, %s864_s28   ;;  %s561_s27 = sphi %s631_s27, %s863_s27   ;;  %s557_s26 = sphi %s629_s26, %s862_s26   ;;  %s553_s2 = sphi %s627_s2, %s861_s2  }
  0x23   : > { %841 = sst [smem:[#allocation20_spill]] %s581_s6  ;;  %s303_s9 = sadd.s32 4294967294, %s585_s7  }
  0x24   : > { %s44_s10 = sadd.s32 1, %s581_s6  ;;  %s48_s11 = sld [smem:[#allocation3 + %s581_s6]] }
  0x25   : > { %p46_p10 = scmp.ge.s32.totalorder %s44_s10, 2  ;;  %s49_s12 = sld [smem:[#allocation4 + %s581_s6]] }
  0x26   : > { %s52_s13 = sld [smem:[#allocation5 + %s581_s6]]  ;;  %s67_s14 = sadd.s32 1, %s573_s30 }
  0x27   : > { %s867_s10 = smov (%p46_p10, %s44_s10), 0  ;;  %p74_p11 = scmp.ne.s32.totalorder %s573_s30, %s569_s29 }
  0x28   : > { %842 = sst [smem:[#allocation21_spill]] %s867_s10  ;;  %p75_p12 = scmp.eq.s32.totalorder %s585_s7, 0 }
  0x29   : > { %s55_s15 = sld [smem:[#allocation3 + %s867_s10]]  ;;  %p80_p13 = scmp.ne.s32.totalorder %s569_s29, %s565_s28 }
  0x2a   : > { %s51_s16 = ssub.s32 1, %s48_s11  ;;  %s56_s17 = sld [smem:[#allocation4 + %s867_s10]] }
  0x2b   : > { %s59_s18 = sld [smem:[#allocation5 + %s867_s10]]  ;;  %p686_p0 = por %p75_p12, %p74_p11 }
  0x2c   : > { %s53_s20 = smul.u32 %s52_s13, %s51_s16  ;;  %p81_p1 = scmp.eq.s32.totalorder %s302_s8, 0 }
  0x2d   : > { %s90_s21 = ssub.s32 %s581_s6, %s867_s10  ;;  %s95_s22 = sadd.s32 1, %s561_s27 }
  0x2e   : > { %p693_p2 = por %p81_p1, %p80_p13  ;;  %p93_p3 = scmp.eq.s32.totalorder %s90_s21, 0 }
  0x2f   : > { %s58_s24 = ssub.s32 1, %s55_s15  ;;  %p105_p4 = scmp.ne.s32.totalorder %s561_s27, %s557_s26 }
  0x30   : > { %s844_s23 = scalar_select %p693_p2, 1, 0 }
  0x31   : > { %s62_s25 = ssub.s32 %s49_s12, %s56_s17  ;;  %p106_p5 = scmp.eq.s32.totalorder %s302_s8, 1 }
  0x32   : > { %s60_s0 = smul.u32 %s59_s18, %s58_s24  ;;  %p111_p6 = scmp.ne.s32.totalorder %s557_s26, %s553_s2 }
  0x33   : > { %s702_s1 = scalar_select %p93_p3, %s561_s27, %s95_s22  }
  0x34   : > { %s63_s28 = ssub.s32 %s53_s20, %s60_s0  ;;  %p704_p7 = por %p106_p5, %p105_p4 }
  0x35   : > { %845 = sst [smem:[#allocation22_spill]] %s702_s1  ;;  %s64_s13 = sor.u32 %s63_s28, %s62_s25 }
  0x36   : > { %s846_s11 = scalar_select %p704_p7, 1, 0 }
  0x37   : > { %p112_p8 = scmp.eq.s32.totalorder %s303_s9, 1  ;;  %p65_p9 = scmp.eq.s32.totalorder %s64_s13, 0 }
  0x38   : > { %p341_p12 = scmp.lt.s32.totalorder %s585_s7, 2  ;;  %s132_s18 = sand.u32 1, %s573_s30  }
  0x39   : > { %p711_p11 = por %p112_p8, %p111_p6  ;;  %s306_s21 = sshll.u32 %s132_s18, 3 }
  0x3a   : > { %s719_s12 = scalar_select %p65_p9, %s573_s30, %s67_s14  }
  0x3b   : > { %s847_s8 = scalar_select %p711_p11, 1, 0 }
  0x3c   : > { %848 = sst [smem:[#allocation23_spill]] %s719_s12  ;;  %p725_p13 = pnand %p341_p12, %p686_p0 }
  0x3d   : > { %s317_s9 = scalar_select %p686_p0, [#allocation3], [#allocation10] }
  0x3e   : > { %s318_s16 = scalar_select %p686_p0, %s581_s6, 0 }
  0x3f   : > { %s869_s9 = smov (!%p341_p12, %s317_s9), [#allocation13]  ;;  %p308_p1 = scmp.ge.s32.totalorder %s585_s7, 1 }
  0x40   : > { %s871_s16 = smov (!%p341_p12, %s318_s16), 0  ;;  %p156_p3 = scmp.lt.s32.totalorder %s585_s7, 3 }
  0x41   : > { %s319_s17 = scalar_select %p686_p0, [#allocation4], [#allocation11] }
  0x42   : > { %s137_s20 = sld [smem:[%s869_s9 + %s871_s16]]  ;;  %p749_p4 = pnand %p308_p1, %p156_p3 }
  0x43   : > { %s873_s17 = smov (!%p341_p12, %s319_s17), [#allocation14]  ;;  %s136_s28 = scalar_lea.vmem [#allocation6], %s306_s21 }
  0x44   : > { %s321_s14 = scalar_select %p686_p0, [#allocation5], [#allocation12] }
  0x45   : > { %s138_s22 = sld [smem:[%s873_s17 + %s871_s16]]  ;;  %s151_s13 = sshll.u32 %s136_s28, 4  ;;  %s753_s13 = int_to_ptr.vmem [resolvable:$true] %s151_s13 }
  0x46   : > { %s875_s14 = smov (!%p341_p12, %s321_s14), [#allocation15]  ;;  %s133_s30 = scalar_lea.sflag [#allocation7], %s132_s18 }
  0x47   : > { %s141_s24 = sld [smem:[%s875_s14 + %s871_s16]]  ;;  %p453_p5 = pneg %p725_p13 }
  0x48   : > { %s850_s25 = scalar_select %p749_p4, 1, 0 }
  0x49   : > { %s140_s0 = ssub.s32 1, %s137_s20  ;;  %s456_s14 = scalar_lea.hbm %s831_s3, 256 }
  0x4d   : > { %s142_s9 = smul.u32 %s141_s24, %s140_s0 }
  0x4f   : > { %s147_s10 = sadd.s32 %s142_s9, %s138_s22 }
  0x50   : > { %s307_s19 = sshll.u32 %s147_s10, 7 }
  0x51   : > { %s149_s12 = scalar_lea.hbm %s831_s3, %s307_s19 }
  0x52   : > { %s451_s1 = scalar_lea.hbm %s149_s12, 128  ;;  %p457_p9 = scmp.lt.s32.totalorder %s149_s12, %s831_s3 }
  0x53   : > { %p452_p0 = scmp.ne.s32.totalorder %s149_s12, %s451_s1  ;;  %p458_p12 = scmp.lt.s32.totalorder %s456_s14, %s451_s1 }
  0x55   : > { %p454_p6 = pnand %p453_p5, %p452_p0  ;;  %p459_p1 = por %p458_p12, %p457_p9 }
  0x57   : > { %p455_p8 = pneg %p454_p6 }
  0x59   : > { %p460_p3 = pnand %p459_p1, %p455_p8 }
  0x5b   : > { %463 = shalt.err (!%p460_p3)
}
  0x5c   : > { %s464_s6 = scalar_lea.vmem %s753_s13, 128  ;;  %s590_s10 = smov [#allocation6]  }
  0x5d   : > { %p465_p10 = scmp.ne.s32.totalorder %s753_s13, %s464_s6  ;;  %s469_s18 = sshll.u32 %s590_s10, 4  ;;  %s470_s18 = int_to_ptr.vmem [resolvable:$false] %s469_s18 }
  0x5e   : > { %s471_s24 = scalar_lea.vmem %s470_s18, 256  ;;  %p472_p6 = scmp.lt.s32.totalorder %s753_s13, %s470_s18 }
  0x5f   : > { %p467_p11 = pnand %p465_p10, %p453_p5  ;;  %p473_p7 = scmp.lt.s32.totalorder %s471_s24, %s464_s6 }
  0x61   : > { %p468_p0 = pneg %p467_p11  ;;  %p474_p2 = por %p473_p7, %p472_p6 }
  0x63   : > { %p475_p4 = pnand %p474_p2, %p468_p0 }
  0x65   : > { %478 = shalt.err (!%p475_p4)
}
  0x66   : > { %336 = dma.hbm_to_vmem [thread:$0]  (!%p725_p13), %s149_s12, 128, %s753_s13, %s133_s30  }
  0x67   : > { %p851_p8 = scmp.ne.s32.totalorder %s850_s25, 0 }
  0x68   : > { %s162_s1 = sand.u32 (!%p851_p8), 1, %s569_s29   ;;  %p852_p10 = scmp.ne.s32.totalorder (!%p851_p8), %s844_s23, 0 }
  0x69   : > { %160 = sbr.rel (%p851_p8) target bundleno = 167 (0xa7), region = 24  ;;  %s309_s0 = sshll.u32 (!%p851_p8), %s162_s1, 3 }
  0x6a   : > { %s163_s28 = scalar_lea.sflag (!%p851_p8), [#allocation7], %s162_s1  ;;  %s166_s9 = scalar_lea.vmem (!%p851_p8), [#allocation6], %s309_s0 }
  0x6e   : > { %544 = dma.done.wait (%p852_p10), %s163_s28, 128  }
  0x6f   : > { %546 = vsyncadd (%p852_p10), %s163_s28, 4294967168  ;;  %s182_s19 = sand.u32 1, %s557_s26   ;;  %s192_s15 = sld [smem:[#allocation3 + %s577_s5]] }
  0x70   : > { %s310_s17 = sshll.u32 %s182_s19, 3 }
  0x71   : > { %s184_s30 = scalar_lea.vmem [#allocation9], %s310_s17 }
  0x75   : > { %p311_p2 = scmp.ne.s32.totalorder %s192_s15, 1 }
  0x77   : > { %196 = sbr.rel (%p311_p2) target bundleno = 128 (0x80), region = 32 }
  0x7c   : > { %v197_v0 = vld [vmem:[%s166_s9] sm:$0xff] }
  0x7d   : > { %v198_v1 = vmul.f32 1.4285715, %v197_v0 }
  0x7f   : > { %199 = vst [vmem:[%s184_s30] sm:$0xff] %v198_v1 }
  0x80 PF: > { %s200_s12 = sld [smem:[#allocation3 + %s577_s5]] }
  0x86   : > { %p312_p7 = scmp.ne.s32.totalorder %s200_s12, 0 }
  0x88   : > { %204 = sbr.rel (%p312_p7) target bundleno = 143 (0x8f), region = 36 }
  0x8d   : > { %v591_v2 = vmov 0.0  }
  0x8e   : > { %205 = vst [vmem:[%s184_s30] sm:$0xff] %v591_v2 }
  0x8f PF: > { %s314_s23 = sshll.u32 %s577_s5, 7  ;;  %s221_s20 = sshll.u32 %s184_s30, 4  ;;  %s222_s20 = int_to_ptr.vmem [resolvable:$true] %s221_s20 }
  0x90   : > { %s219_s16 = scalar_lea.hbm %s832_s4, %s314_s23  ;;  %s207_s14 = scalar_lea.sflag [#allocation8], %s182_s19 }
  0x91   : > { %s479_s21 = scalar_lea.vmem %s222_s20, 128  ;;  %p853_p13 = scmp.ne.s32.totalorder %s846_s11, 0 }
  0x92   : > { %p480_p11 = scmp.ne.s32.totalorder %s222_s20, %s479_s21  ;;  %s592_s22 = smov [#allocation9]  }
  0x93   : > { %s483_s6 = sshll.u32 %s592_s22, 4  ;;  %s484_s6 = int_to_ptr.vmem [resolvable:$false] %s483_s6 }
  0x94   : > { %p481_p4 = pnand %p480_p11, %p853_p13  ;;  %s485_s10 = scalar_lea.vmem %s484_s6, 256 }
  0x95   : > { %p486_p9 = scmp.lt.s32.totalorder %s222_s20, %s484_s6  ;;  %p487_p12 = scmp.lt.s32.totalorder %s485_s10, %s479_s21 }
  0x96   : > { %p482_p5 = pneg %p481_p4 }
  0x97   : > { %p488_p1 = por %p487_p12, %p486_p9 }
  0x99   : > { %p489_p3 = pnand %p488_p1, %p482_p5 }
  0x9b   : > { %492 = shalt.err (!%p489_p3)
}
  0x9c   : > { %s493_s5 = scalar_lea.hbm %s219_s16, 128  ;;  %s497_s1 = scalar_lea.hbm %s832_s4, 256 }
  0x9d   : > { %p494_p0 = scmp.ne.s32.totalorder %s219_s16, %s493_s5  ;;  %p498_p10 = scmp.lt.s32.totalorder %s219_s16, %s832_s4 }
  0x9e   : > { %p499_p2 = scmp.lt.s32.totalorder %s497_s1, %s493_s5 }
  0x9f   : > { %p495_p6 = pnand %p494_p0, %p853_p13 }
  0xa0   : > { %p500_p7 = por %p499_p2, %p498_p10 }
  0xa1   : > { %p496_p8 = pneg %p495_p6 }
  0xa3   : > { %p501_p11 = pnand %p500_p7, %p496_p8 }
  0xa5   : > { %504 = shalt.err (!%p501_p11)
}
  0xa6   : > { %325 = dma.vmem_to_hbm [thread:$0]  (%p853_p13), %s222_s20, 128, %s219_s16, %s207_s14  }
  0xa7 PF: > { %s233_s9 = sand.u32 1, %s553_s2   ;;  %p854_p4 = scmp.ne.s32.totalorder %s847_s8, 0 }
  0xa8   : > { %p855_p5 = scmp.ge.s32.totalorder %s585_s7, 2  ;;  %s234_s19 = scalar_lea.sflag [#allocation8], %s233_s9 }
  0xaa   : > { %p338_p9 = pnand %p855_p5, %p854_p4 }
  0xac   : > { %p339_p12 = pneg %p338_p9 }
  0xae   : > { %548 = dma.done.wait (%p339_p12), %s234_s19, 128  }
  0xaf   : > { %550 = vsyncadd (%p339_p12), %s234_s19, 4294967168  ;;  %s32_s7 = sadd.s32 1, %s585_s7   ;;  %s856_s15 = sld [smem:[#allocation22_spill]] }
  0xb0   : > { %p29_p1 = scmp.ge.s32.totalorder %s32_s7, 4   ;;  %s857_s11 = sld [smem:[#allocation19_spill]] }
  0xb1   : > { %s858_s30 = sld [smem:[#allocation23_spill]]  ;;  %s861_s2 = smov %s557_s26 }
  0xb2   : > { %s859_s5 = sld [smem:[#allocation20_spill]]  ;;  %s862_s26 = smov %s561_s27 }
  0xb3   : > { %s860_s6 = sld [smem:[#allocation21_spill]]  ;;  %s864_s28 = smov %s569_s29 }
  0xb4   :  { %31 = sbr.rel (!%p29_p1) target bundleno = 34 (0x22), region = 77 }
  0xb5   : > { %s863_s27 = smov %s856_s15 }
  0xb6   : > { %s865_s29 = smov %s857_s11 }
  0xb9   :  { %239 = vsyncpa [#allocation7], 1 }
  0xba   :  { %241 = vsyncpa [#allocation7 + $0x1], 1 }
  0xbb   :  { %242 = vsyncpa [#allocation8], 1 }
  0xbc   :  { %244 = vsyncpa [#allocation8 + $0x1], 1 }

</bundles_post_ra>
